<compile_context>
chip_gen: v5e
topology: v5e:2x2
jax: 0.10.0
libtpu: 0.0.40
codegen_flags: <defaults>
</compile_context>

<pallas_src>
import functools
import math

import jax
import jax.numpy as jnp
from jax import lax
from jax.experimental import pallas as pl
from jax.experimental.pallas import tpu as pltpu


# --------------------------------------------------------------------------
# Fused forward kernel: 3 x TransformerConv(+ReLU) -> mean pool -> Linear
# --------------------------------------------------------------------------
def trans_fused_kernel(x_ref, adj_ref, pmat_ref,
                       w1_ref, b1_ref, w2_ref, b2_ref, w3_ref, b3_ref,
                       wl_ref, bl_ref, out_ref, *, hidden):
    adj = adj_ref[...]                                   # [N, N], 1.0 where edge j->i

    def conv_layer(x, w_ref, b_ref, apply_relu):
        # One packed projection: [N, F_in] @ [F_in, 4H] -> lane-dense [N, 4H].
        # (1/sqrt(H) attention scale is already folded into the Wq/bq columns.)
        proj = jnp.dot(x, w_ref[...], preferred_element_type=jnp.float32) + b_ref[...]
        q = proj[:, 0 * hidden:1 * hidden]
        k = proj[:, 1 * hidden:2 * hidden]
        v = proj[:, 2 * hidden:3 * hidden]
        skip = proj[:, 3 * hidden:4 * hidden]            # lin_skip (root weight)

        # scores[i, j] = <q_i, k_j>  -- contract on feature dim, no explicit k.T
        scores = lax.dot_general(q, k, (((1,), (1,)), ((), ())),
                                 preferred_element_type=jnp.float32)

        # Masked, numerically-safe softmax over incoming edges only.
        # Row max over the full row is valid (shift invariance); masking is done
        # once, by zeroing non-edges after exp.  Isolated nodes -> alpha = 0.
        m = jnp.max(scores, axis=1, keepdims=True)
        p = jnp.exp(scores - m) * adj
        s = jnp.sum(p, axis=1, keepdims=True)
        alpha = p * pl.reciprocal(jnp.where(s > 0, s, 1.0), approx=True)

        out = jnp.dot(alpha, v, preferred_element_type=jnp.float32) + skip
        if apply_relu:
            out = jnp.maximum(out, 0.0)
        return out

    h = conv_layer(x_ref[...], w1_ref, b1_ref, apply_relu=True)
    h = conv_layer(h, w2_ref, b2_ref, apply_relu=True)
    h = conv_layer(h, w3_ref, b3_ref, apply_relu=False)

    # global_mean_pool + (eval-mode dropout == identity) + final Linear.
    pooled = jnp.dot(pmat_ref[...], h, preferred_element_type=jnp.float32)
    out_ref[...] = (jnp.dot(pooled, wl_ref[...], preferred_element_type=jnp.float32)
                    + bl_ref[...])


def trans_forward(x, adj, pmat, params):
    g = pmat.shape[0]
    hidden = params["w2"].shape[0]           # conv2 input dim == hidden_channels
    c = params["lin_w"].shape[1]
    kernel = functools.partial(trans_fused_kernel, hidden=hidden)
    vmem = pl.BlockSpec(memory_space=pltpu.MemorySpace.VMEM)
    return pl.pallas_call(
        kernel,
        out_shape=jax.ShapeDtypeStruct((g, c), jnp.float32),
        in_specs=[vmem] * 11,
        out_specs=vmem,
    )(x, adj, pmat,
      params["w1"], params["b1"],
      params["w2"], params["b2"],
      params["w3"], params["b3"],
      params["lin_w"], params["lin_b"])


# --------------------------------------------------------------------------
# Parameter construction (packed Q/K/V/skip weights, scale folded into Wq)
# --------------------------------------------------------------------------
def make_linear_params(key, fan_in, fan_out):
    kw, kb = jax.random.split(key)
    w = jax.random.normal(kw, (fan_in, fan_out), jnp.float32) * 0.1   # [in, out]
    b = jax.random.normal(kb, (1, fan_out), jnp.float32) * 0.1
    return w, b


def make_conv_packed_params(key, fan_in, hidden):
    ks = jax.random.split(key, 4)
    wq, bq = make_linear_params(ks[0], fan_in, hidden)
    wk, bk = make_linear_params(ks[1], fan_in, hidden)
    wv, bv = make_linear_params(ks[2], fan_in, hidden)
    ws, bs = make_linear_params(ks[3], fan_in, hidden)   # lin_skip (root weight)
    scale = 1.0 / math.sqrt(hidden)                      # heads=1, d_head=hidden
    # Fold the attention scale into the query projection (zero runtime cost).
    w = jnp.concatenate([wq * scale, wk, wv, ws], axis=1)   # [fan_in, 4H]
    b = jnp.concatenate([bq * scale, bk, bv, bs], axis=1)   # [1, 4H]
    return w, b


if __name__ == "__main__":
    num_node_features = 8
    hidden_channels = 32
    num_label_features = 4
    nodes_per_graph = 8
    num_graphs = 2
    N = nodes_per_graph * num_graphs

    key = jax.random.PRNGKey(0)
    k_x, k_c1, k_c2, k_c3, k_lin = jax.random.split(key, 5)

    # Node features.
    x = jax.random.normal(k_x, (N, num_node_features), jnp.float32)

    # Bidirectional ring graph inside each of the two graphs.
    src, dst = [], []
    for g in range(num_graphs):
        base = g * nodes_per_graph
        for i in range(nodes_per_graph):
            j = (i + 1) % nodes_per_graph
            src += [base + i, base + j]
            dst += [base + j, base + i]
    edge_index = jnp.array([src, dst], dtype=jnp.int32)   # [2, E]

    # Dense adjacency mask: adj[target, source] = 1.0
    adj = jnp.zeros((N, N), jnp.float32).at[edge_index[1], edge_index[0]].set(1.0)

    # Batch vector and mean-pool matrix pmat[g, n] = 1/count_g.
    batch = jnp.repeat(jnp.arange(num_graphs, dtype=jnp.int32), nodes_per_graph)
    onehot = (batch[None, :] == jnp.arange(num_graphs)[:, None]).astype(jnp.float32)
    counts = jnp.sum(onehot, axis=1, keepdims=True)
    pmat = onehot / jnp.maximum(counts, 1.0)

    w1, b1 = make_conv_packed_params(k_c1, num_node_features, hidden_channels)
    w2, b2 = make_conv_packed_params(k_c2, hidden_channels, hidden_channels)
    w3, b3 = make_conv_packed_params(k_c3, hidden_channels, hidden_channels)
    lin_w, lin_b = make_linear_params(k_lin, hidden_channels, num_label_features)
    params = dict(w1=w1, b1=b1, w2=w2, b2=b2, w3=w3, b3=b3,
                  lin_w=lin_w, lin_b=lin_b)

    # TODO(synk): dropout is implemented as eval-mode identity; a training-mode
    # variant would use pltpu.prng_seed + pltpu.stateful_bernoulli.
    out = jax.jit(trans_forward)(x, adj, pmat, params)
    out = jax.block_until_ready(out)
    assert out.shape == (num_graphs, num_label_features)
    assert bool(jnp.all(jnp.isfinite(out)))
    print("KERNEL_OK")
</pallas_src>

<mosaic_0001>
module attributes {stable_mosaic.version = 11 : i64} {
  func.func @trans_fused_kernel(%arg0: memref<16x8xf32, #tpu.memory_space<vmem>>, %arg1: memref<16x16xf32, #tpu.memory_space<vmem>>, %arg2: memref<2x16xf32, #tpu.memory_space<vmem>>, %arg3: memref<8x128xf32, #tpu.memory_space<vmem>>, %arg4: memref<1x128xf32, #tpu.memory_space<vmem>>, %arg5: memref<32x128xf32, #tpu.memory_space<vmem>>, %arg6: memref<1x128xf32, #tpu.memory_space<vmem>>, %arg7: memref<32x128xf32, #tpu.memory_space<vmem>>, %arg8: memref<1x128xf32, #tpu.memory_space<vmem>>, %arg9: memref<32x4xf32, #tpu.memory_space<vmem>>, %arg10: memref<1x4xf32, #tpu.memory_space<vmem>>, %arg11: memref<2x4xf32, #tpu.memory_space<vmem>>) attributes {dimension_semantics = [], scalar_prefetch = 0 : i64, scratch_operands = 0 : i64, tpu.core_type = #tpu.core_type<tc>} {
    %c0 = arith.constant 0 : index
    %c0_0 = arith.constant 0 : index
    %0 = vector.load %arg1[%c0, %c0_0] : memref<16x16xf32, #tpu.memory_space<vmem>>, vector<16x16xf32>
    %c0_1 = arith.constant 0 : index
    %c0_2 = arith.constant 0 : index
    %1 = vector.load %arg0[%c0_1, %c0_2] : memref<16x8xf32, #tpu.memory_space<vmem>>, vector<16x8xf32>
    %c0_3 = arith.constant 0 : index
    %c0_4 = arith.constant 0 : index
    %2 = vector.load %arg3[%c0_3, %c0_4] : memref<8x128xf32, #tpu.memory_space<vmem>>, vector<8x128xf32>
    %cst = arith.constant dense<0.000000e+00> : vector<16x128xf32>
    %3 = tpu.matmul %1, %2, %cst {dimension_numbers = #tpu.dot_dimension_numbers<[1], [0], [0], [1], [0, 0, 1, 1], [], []>} : vector<16x8xf32>, vector<8x128xf32>, vector<16x128xf32> -> vector<16x128xf32>
    %c0_5 = arith.constant 0 : index
    %c0_6 = arith.constant 0 : index
    %4 = vector.load %arg4[%c0_5, %c0_6] : memref<1x128xf32, #tpu.memory_space<vmem>>, vector<1x128xf32>
    %5 = vector.broadcast %4 : vector<1x128xf32> to vector<16x128xf32>
    %6 = arith.addf %3, %5 : vector<16x128xf32>
    %7 = vector.extract_strided_slice %6 {offsets = [0, 0], sizes = [16, 32], strides = [1, 1]} : vector<16x128xf32> to vector<16x32xf32>
    %8 = vector.extract_strided_slice %6 {offsets = [0, 32], sizes = [16, 32], strides = [1, 1]} : vector<16x128xf32> to vector<16x32xf32>
    %9 = vector.extract_strided_slice %6 {offsets = [0, 64], sizes = [16, 32], strides = [1, 1]} : vector<16x128xf32> to vector<16x32xf32>
    %10 = vector.extract_strided_slice %6 {offsets = [0, 96], sizes = [16, 32], strides = [1, 1]} : vector<16x128xf32> to vector<16x32xf32>
    %cst_7 = arith.constant dense<0.000000e+00> : vector<16x16xf32>
    %11 = tpu.matmul %7, %8, %cst_7 {dimension_numbers = #tpu.dot_dimension_numbers<[1], [1], [0], [0], [0, 0, 1, 0], [], []>} : vector<16x32xf32>, vector<16x32xf32>, vector<16x16xf32> -> vector<16x16xf32>
    %cst_8 = arith.constant dense<0xFF800000> : vector<16xf32>
    %12 = vector.multi_reduction <maximumf>, %11, %cst_8 [1] : vector<16x16xf32> to vector<16xf32>
    %13 = vector.shape_cast %12 : vector<16xf32> to vector<16x1xf32>
    %14 = vector.broadcast %13 : vector<16x1xf32> to vector<16x16xf32>
    %15 = arith.subf %11, %14 : vector<16x16xf32>
    %16 = math.exp %15 : vector<16x16xf32>
    %17 = arith.mulf %16, %0 : vector<16x16xf32>
    %cst_9 = arith.constant dense<0.000000e+00> : vector<16xf32>
    %18 = vector.multi_reduction <add>, %17, %cst_9 [1] : vector<16x16xf32> to vector<16xf32>
    %19 = vector.shape_cast %18 : vector<16xf32> to vector<16x1xf32>
    %cst_10 = arith.constant 0.000000e+00 : f32
    %20 = vector.broadcast %cst_10 : f32 to vector<16x1xf32>
    %21 = arith.cmpf ogt, %19, %20 : vector<16x1xf32>
    %cst_11 = arith.constant 1.000000e+00 : f32
    %22 = vector.broadcast %cst_11 : f32 to vector<16x1xf32>
    %23 = arith.select %21, %19, %22 : vector<16x1xi1>, vector<16x1xf32>
    %24 = tpu.reciprocal %23 {approx = true} : vector<16x1xf32> -> vector<16x1xf32>
    %25 = vector.broadcast %24 : vector<16x1xf32> to vector<16x16xf32>
    %26 = arith.mulf %17, %25 : vector<16x16xf32>
    %cst_12 = arith.constant dense<0.000000e+00> : vector<16x32xf32>
    %27 = tpu.matmul %26, %9, %cst_12 {dimension_numbers = #tpu.dot_dimension_numbers<[1], [0], [0], [1], [0, 0, 1, 1], [], []>} : vector<16x16xf32>, vector<16x32xf32>, vector<16x32xf32> -> vector<16x32xf32>
    %28 = arith.addf %27, %10 : vector<16x32xf32>
    %cst_13 = arith.constant 0.000000e+00 : f32
    %29 = vector.broadcast %cst_13 : f32 to vector<16x32xf32>
    %30 = arith.maximumf %28, %29 : vector<16x32xf32>
    %c0_14 = arith.constant 0 : index
    %c0_15 = arith.constant 0 : index
    %31 = vector.load %arg5[%c0_14, %c0_15] : memref<32x128xf32, #tpu.memory_space<vmem>>, vector<32x128xf32>
    %cst_16 = arith.constant dense<0.000000e+00> : vector<16x128xf32>
    %32 = tpu.matmul %30, %31, %cst_16 {dimension_numbers = #tpu.dot_dimension_numbers<[1], [0], [0], [1], [0, 0, 1, 1], [], []>} : vector<16x32xf32>, vector<32x128xf32>, vector<16x128xf32> -> vector<16x128xf32>
    %c0_17 = arith.constant 0 : index
    %c0_18 = arith.constant 0 : index
    %33 = vector.load %arg6[%c0_17, %c0_18] : memref<1x128xf32, #tpu.memory_space<vmem>>, vector<1x128xf32>
    %34 = vector.broadcast %33 : vector<1x128xf32> to vector<16x128xf32>
    %35 = arith.addf %32, %34 : vector<16x128xf32>
    %36 = vector.extract_strided_slice %35 {offsets = [0, 0], sizes = [16, 32], strides = [1, 1]} : vector<16x128xf32> to vector<16x32xf32>
    %37 = vector.extract_strided_slice %35 {offsets = [0, 32], sizes = [16, 32], strides = [1, 1]} : vector<16x128xf32> to vector<16x32xf32>
    %38 = vector.extract_strided_slice %35 {offsets = [0, 64], sizes = [16, 32], strides = [1, 1]} : vector<16x128xf32> to vector<16x32xf32>
    %39 = vector.extract_strided_slice %35 {offsets = [0, 96], sizes = [16, 32], strides = [1, 1]} : vector<16x128xf32> to vector<16x32xf32>
    %cst_19 = arith.constant dense<0.000000e+00> : vector<16x16xf32>
    %40 = tpu.matmul %36, %37, %cst_19 {dimension_numbers = #tpu.dot_dimension_numbers<[1], [1], [0], [0], [0, 0, 1, 0], [], []>} : vector<16x32xf32>, vector<16x32xf32>, vector<16x16xf32> -> vector<16x16xf32>
    %cst_20 = arith.constant dense<0xFF800000> : vector<16xf32>
    %41 = vector.multi_reduction <maximumf>, %40, %cst_20 [1] : vector<16x16xf32> to vector<16xf32>
    %42 = vector.shape_cast %41 : vector<16xf32> to vector<16x1xf32>
    %43 = vector.broadcast %42 : vector<16x1xf32> to vector<16x16xf32>
    %44 = arith.subf %40, %43 : vector<16x16xf32>
    %45 = math.exp %44 : vector<16x16xf32>
    %46 = arith.mulf %45, %0 : vector<16x16xf32>
    %cst_21 = arith.constant dense<0.000000e+00> : vector<16xf32>
    %47 = vector.multi_reduction <add>, %46, %cst_21 [1] : vector<16x16xf32> to vector<16xf32>
    %48 = vector.shape_cast %47 : vector<16xf32> to vector<16x1xf32>
    %cst_22 = arith.constant 0.000000e+00 : f32
    %49 = vector.broadcast %cst_22 : f32 to vector<16x1xf32>
    %50 = arith.cmpf ogt, %48, %49 : vector<16x1xf32>
    %cst_23 = arith.constant 1.000000e+00 : f32
    %51 = vector.broadcast %cst_23 : f32 to vector<16x1xf32>
    %52 = arith.select %50, %48, %51 : vector<16x1xi1>, vector<16x1xf32>
    %53 = tpu.reciprocal %52 {approx = true} : vector<16x1xf32> -> vector<16x1xf32>
    %54 = vector.broadcast %53 : vector<16x1xf32> to vector<16x16xf32>
    %55 = arith.mulf %46, %54 : vector<16x16xf32>
    %cst_24 = arith.constant dense<0.000000e+00> : vector<16x32xf32>
    %56 = tpu.matmul %55, %38, %cst_24 {dimension_numbers = #tpu.dot_dimension_numbers<[1], [0], [0], [1], [0, 0, 1, 1], [], []>} : vector<16x16xf32>, vector<16x32xf32>, vector<16x32xf32> -> vector<16x32xf32>
    %57 = arith.addf %56, %39 : vector<16x32xf32>
    %cst_25 = arith.constant 0.000000e+00 : f32
    %58 = vector.broadcast %cst_25 : f32 to vector<16x32xf32>
    %59 = arith.maximumf %57, %58 : vector<16x32xf32>
    %c0_26 = arith.constant 0 : index
    %c0_27 = arith.constant 0 : index
    %60 = vector.load %arg7[%c0_26, %c0_27] : memref<32x128xf32, #tpu.memory_space<vmem>>, vector<32x128xf32>
    %cst_28 = arith.constant dense<0.000000e+00> : vector<16x128xf32>
    %61 = tpu.matmul %59, %60, %cst_28 {dimension_numbers = #tpu.dot_dimension_numbers<[1], [0], [0], [1], [0, 0, 1, 1], [], []>} : vector<16x32xf32>, vector<32x128xf32>, vector<16x128xf32> -> vector<16x128xf32>
    %c0_29 = arith.constant 0 : index
    %c0_30 = arith.constant 0 : index
    %62 = vector.load %arg8[%c0_29, %c0_30] : memref<1x128xf32, #tpu.memory_space<vmem>>, vector<1x128xf32>
    %63 = vector.broadcast %62 : vector<1x128xf32> to vector<16x128xf32>
    %64 = arith.addf %61, %63 : vector<16x128xf32>
    %65 = vector.extract_strided_slice %64 {offsets = [0, 0], sizes = [16, 32], strides = [1, 1]} : vector<16x128xf32> to vector<16x32xf32>
    %66 = vector.extract_strided_slice %64 {offsets = [0, 32], sizes = [16, 32], strides = [1, 1]} : vector<16x128xf32> to vector<16x32xf32>
    %67 = vector.extract_strided_slice %64 {offsets = [0, 64], sizes = [16, 32], strides = [1, 1]} : vector<16x128xf32> to vector<16x32xf32>
    %68 = vector.extract_strided_slice %64 {offsets = [0, 96], sizes = [16, 32], strides = [1, 1]} : vector<16x128xf32> to vector<16x32xf32>
    %cst_31 = arith.constant dense<0.000000e+00> : vector<16x16xf32>
    %69 = tpu.matmul %65, %66, %cst_31 {dimension_numbers = #tpu.dot_dimension_numbers<[1], [1], [0], [0], [0, 0, 1, 0], [], []>} : vector<16x32xf32>, vector<16x32xf32>, vector<16x16xf32> -> vector<16x16xf32>
    %cst_32 = arith.constant dense<0xFF800000> : vector<16xf32>
    %70 = vector.multi_reduction <maximumf>, %69, %cst_32 [1] : vector<16x16xf32> to vector<16xf32>
    %71 = vector.shape_cast %70 : vector<16xf32> to vector<16x1xf32>
    %72 = vector.broadcast %71 : vector<16x1xf32> to vector<16x16xf32>
    %73 = arith.subf %69, %72 : vector<16x16xf32>
    %74 = math.exp %73 : vector<16x16xf32>
    %75 = arith.mulf %74, %0 : vector<16x16xf32>
    %cst_33 = arith.constant dense<0.000000e+00> : vector<16xf32>
    %76 = vector.multi_reduction <add>, %75, %cst_33 [1] : vector<16x16xf32> to vector<16xf32>
    %77 = vector.shape_cast %76 : vector<16xf32> to vector<16x1xf32>
    %cst_34 = arith.constant 0.000000e+00 : f32
    %78 = vector.broadcast %cst_34 : f32 to vector<16x1xf32>
    %79 = arith.cmpf ogt, %77, %78 : vector<16x1xf32>
    %cst_35 = arith.constant 1.000000e+00 : f32
    %80 = vector.broadcast %cst_35 : f32 to vector<16x1xf32>
    %81 = arith.select %79, %77, %80 : vector<16x1xi1>, vector<16x1xf32>
    %82 = tpu.reciprocal %81 {approx = true} : vector<16x1xf32> -> vector<16x1xf32>
    %83 = vector.broadcast %82 : vector<16x1xf32> to vector<16x16xf32>
    %84 = arith.mulf %75, %83 : vector<16x16xf32>
    %cst_36 = arith.constant dense<0.000000e+00> : vector<16x32xf32>
    %85 = tpu.matmul %84, %67, %cst_36 {dimension_numbers = #tpu.dot_dimension_numbers<[1], [0], [0], [1], [0, 0, 1, 1], [], []>} : vector<16x16xf32>, vector<16x32xf32>, vector<16x32xf32> -> vector<16x32xf32>
    %86 = arith.addf %85, %68 : vector<16x32xf32>
    %c0_37 = arith.constant 0 : index
    %c0_38 = arith.constant 0 : index
    %87 = vector.load %arg2[%c0_37, %c0_38] : memref<2x16xf32, #tpu.memory_space<vmem>>, vector<2x16xf32>
    %cst_39 = arith.constant dense<0.000000e+00> : vector<2x32xf32>
    %88 = tpu.matmul %87, %86, %cst_39 {dimension_numbers = #tpu.dot_dimension_numbers<[1], [0], [0], [1], [0, 0, 1, 1], [], []>} : vector<2x16xf32>, vector<16x32xf32>, vector<2x32xf32> -> vector<2x32xf32>
    %c0_40 = arith.constant 0 : index
    %c0_41 = arith.constant 0 : index
    %89 = vector.load %arg9[%c0_40, %c0_41] : memref<32x4xf32, #tpu.memory_space<vmem>>, vector<32x4xf32>
    %cst_42 = arith.constant dense<0.000000e+00> : vector<2x4xf32>
    %90 = tpu.matmul %88, %89, %cst_42 {dimension_numbers = #tpu.dot_dimension_numbers<[1], [0], [0], [1], [0, 0, 1, 1], [], []>} : vector<2x32xf32>, vector<32x4xf32>, vector<2x4xf32> -> vector<2x4xf32>
    %c0_43 = arith.constant 0 : index
    %c0_44 = arith.constant 0 : index
    %91 = vector.load %arg10[%c0_43, %c0_44] : memref<1x4xf32, #tpu.memory_space<vmem>>, vector<1x4xf32>
    %92 = vector.broadcast %91 : vector<1x4xf32> to vector<2x4xf32>
    %93 = arith.addf %90, %92 : vector<2x4xf32>
    %c0_45 = arith.constant 0 : index
    %c0_46 = arith.constant 0 : index
    %94 = vector.load %arg11[%c0_45, %c0_46] : memref<2x4xf32, #tpu.memory_space<vmem>>, vector<2x4xf32>
    tpu.vector_store %arg11[%c0_45, %c0_46], %93 {strides = array<i32>} : memref<2x4xf32, #tpu.memory_space<vmem>>, vector<2x4xf32>,
    return
  }
}

</mosaic_0001>

<bundles_post_ra>
// kernel: trans_forward.1
= control target key start
LH: loop header
LB: loop body
LE: loop exit
PB: predicated region body
PF: predicated region fallthrough
CT: control target
= control target key end

     0   :  { %16 = vsyncpa [#allocation3], 0  ;;  %s926_s0 = inlined_call_operand.vmem [shape: f32[16,8], index: 0, kind: input, shape index: {}]   ;;  %s927_s1 = inlined_call_operand.vmem [shape: f32[16,16], index: 1, kind: input, shape index: {}]   ;;  %s928_s2 = inlined_call_operand.hbm [shape: f32[2,16], index: 2, kind: input, shape index: {}]   ;;  %s929_s3 = inlined_call_operand.vmem [shape: f32[8,128], index: 3, kind: input, shape index: {}]   ;;  %s930_s4 = inlined_call_operand.vmem [shape: f32[1,128], index: 4, kind: input, shape index: {}]   ;;  %s931_s5 = inlined_call_operand.vmem [shape: f32[32,128], index: 5, kind: input, shape index: {}]   ;;  %s932_s6 = inlined_call_operand.vmem [shape: f32[1,128], index: 6, kind: input, shape index: {}]   ;;  %s933_s7 = inlined_call_operand.hbm [shape: f32[32,128], index: 7, kind: input, shape index: {}]   ;;  %s934_s8 = inlined_call_operand.vmem [shape: f32[1,128], index: 8, kind: input, shape index: {}]   ;;  %s935_s9 = inlined_call_operand.vmem [shape: f32[32,4], index: 9, kind: input, shape index: {}]   ;;  %s936_s10 = inlined_call_operand.vmem [shape: f32[1,4], index: 10, kind: input, shape index: {}]   ;;  %s937_s11 = inlined_call_operand.hbm [shape: f32[2,4], index: 11, kind: output, shape index: {}]  }
   0x1   :  { %17 = vsyncpa [#allocation6], 0 }
   0x2   :  { %18 = vsyncpa [#allocation4], 0  ;;  %s28_s19 = sshll.u32 %s928_s2, 4  ;;  %s737_s20 = smov [#allocation2]   ;;  %s29_s19 = int_to_ptr.hbm [resolvable:$true] %s28_s19 }
   0x3   :  { %s30_s21 = sshll.u32 %s737_s20, 4  ;;  %s46_s24 = sshll.u32 %s933_s7, 4  ;;  %s31_s21 = int_to_ptr.vmem [resolvable:$true] %s30_s21  ;;  %s47_s24 = int_to_ptr.hbm [resolvable:$true] %s46_s24 }
   0x4   :  { %33 = dma.hbm_to_vmem [thread:$0]  %s29_s19, 32, %s31_s21, [#allocation3]  }
   0x5   :  { %s738_s25 = smov [#allocation5]   ;;  %s739_s27 = smov 128  }
   0x6   :  { %s48_s26 = sshll.u32 %s738_s25, 4  ;;  %s740_s28 = smov 8   ;;  %s49_s26 = int_to_ptr.vmem [resolvable:$true] %s48_s26 }
   0x7   :  { %54 = dma.hbm_to_vmem [thread:$0]  %s47_s24, 512, %s49_s26, [#allocation6], %s739_s27, %s739_s27, %s740_s28  }
   0x8   :  { %731 = dma.done.wait [#allocation3], 32  }
   0x9   :  { %732 = vsyncadd [#allocation3], 4294967264 }
   0xa   :  { %733 = dma.done.wait [#allocation6], 512  }
   0xb   :  { %734 = vsyncadd [#allocation6], 4294966784  ;;  %vm78_vm0 = vcmask 64512   ;;  %v73_v0 = vld [vmem:[%s929_s3] sm:$0xff]  ;;  %v72_v1 = vld [vmem:[%s926_s0 + $0x8] sm:$0xff]  ;;  %s741_s16 = smov 96  }
   0xc   :  { %v71_v2 = vld [vmem:[%s926_s0] sm:$0xff]  ;;  %607 = vmatpush.msra.mxu3 %v73_v0  ;;  %100 = vmatpush.msra.mxu0 %v73_v0  ;;  %s742_s3 = smov 64   ;;  %vm114_vm1 = vcmask 261120   ;;  %vm146_vm2 = vcmask 130048   ;;  %s743_s0 = smov 32   ;;  %v843_v28 = vld [vmem:[%s927_s1 + $0x8] sm:$0xff] }
   0xd   :  { %582 = vmatmul.msk.f32.vlgmr.msra.gmra.mxu3 %vm78_vm0, %v72_v1  ;;  %581 = vmatmul.msk.f32.vlgmr.msra.gmra.mxu0 %vm78_vm0, %v71_v2  ;;  %v631_v3 = vld [vmem:[%s930_s4] ss:$0 sm:$0xff]  ;;  %v221_v32 = vld [vmem:[%s931_s5 + $0x18] sm:$0xff]  ;;  %v220_v41 = vld [vmem:[%s931_s5 + $0x10] sm:$0xff]  ;;  %s570_s17 = sshll.u32 %s937_s11, 4  ;;  %vm561_vm9 = vcmask 25600   ;;  %s571_s17 = int_to_ptr.hbm [resolvable:$true] %s570_s17 }
   0xe   :  { %v836_v23 = vld [vmem:[%s927_s1] sm:$0xff]  ;;  %244 = vmatpush.msrb.mxu3 %v221_v32  ;;  %v219_v42 = vld [vmem:[%s931_s5 + $0x8] sm:$0xff] }
   0xf   :  { %v218_v43 = vld [vmem:[%s931_s5] sm:$0xff] }
  0x10   :  { %245 = vmatpush.msrb.mxu3 %v220_v41  ;;  %v632_v53 = vld [vmem:[%s932_s6] ss:$0 sm:$0xff] }
  0x12   :  { %246 = vmatpush.msrb.mxu3 %v219_v42 }
  0x14   :  { %247 = vmatpush.msrb.mxu3 %v218_v43 }
  0x8a   :  { %v102_v6 = vpop.f32.mrf.mxu0 }
  0x8b   :  { %v103_v7 = vadd.f32 %v631_v3, %v102_v6 }
  0x90   :  { %v105_v4 = vpop.f32.mrf.mxu3 }
  0x91   :  { %v106_v5 = vadd.f32 %v631_v3, %v105_v4 }
  0x93   :  { %112 = vrot.lane.b32.xlu0 %v106_v5, %s741_s16  ;;  %v616_v8 = vpack.i.bf16 %v103_v7, %v106_v5 }
  0x9b   :  { %110 = vrot.lane.b32.xlu0 %v103_v7, %s741_s16 }
  0xa3   :  { %617 = vrot.lane.b32.xlu0 %v616_v8, %s742_s3 }
 0x105   :  { %v113_v9 = vpop.permute.xlu0 %112 }
 0x106   :  { %583 = vmatpush.xpose.msk.msra.mxu1 %vm114_vm1, %v113_v9 }
 0x10d   :  { %v111_v10 = vpop.permute.xlu0 %110 }
 0x10e   :  { %584 = vmatpush.xpose.msk.msra.mxu1 %vm114_vm1, %v111_v10 }
 0x111   :  { %585 = vmatmul.msk.f32.vlgmr.msra.gmra.mxu1 %vm114_vm1, %v103_v7 }
 0x115   :  { %v618_v11 = vpop.permute.xlu0 %617 }
 0x116   :  { %v619_v12 = vunpack.i.l.bf16 %v618_v11  ;;  %v620_v13 = vunpack.i.h.bf16 %v618_v11 }
 0x118   :  { %207 = vmatpush.msra.mxu2 %v619_v12 }
 0x119   :  { %586 = vmatmul.msk.f32.gmra.mxu1 %vm114_vm1, %v106_v5 }
 0x11a   :  { %208 = vmatpush.msra.mxu2 %v620_v13 }
 0x18e   :  { %v140_v14 = vpop.f32.mrf.mxu1 }
 0x18f   :  { %v147_v15 = vsel %vm146_vm2, %v140_v14, -inf }
 0x190   :  { %148 = vmax.xlane.f32.xlu1 %v147_v15  ;;  %v366_v15 = vld [vmem:[#allocation5 + $0x18] sm:$0xff] }
 0x191   :  { %389 = vmatpush.msrb.mxu1 %v366_v15 }
 0x196   :  { %v143_v16 = vpop.f32.mrf.mxu1 }
 0x197   :  { %v150_v17 = vsel %vm146_vm2, %v143_v16, -inf }
 0x198   :  { %151 = vmax.xlane.f32.xlu1 %v150_v17 }
 0x1b1   :  { %181 = vrot.lane.b32.xlu1 %v103_v7, %s743_s0 }
 0x203   :  { %v149_v18 = vpop.xlane.xlu1 %148 }
 0x204   :  { %v153_v19 = vsub.f32 %v140_v14, %v149_v18 }
 0x206   :  { %v155_v20 = vmul.f32 1.442695, %v153_v19 }
 0x208   :  { %635 = vpow2.f32 %v155_v20 }
 0x20b   :  { %v152_v21 = vpop.xlane.xlu1 %151 }
 0x20c   :  { %v154_v22 = vsub.f32 %v143_v16, %v152_v21 }
 0x20e   :  { %v636_v24 = vpop.eup %635  ;;  %v157_v25 = vmul.f32 1.442695, %v154_v22 }
 0x20f   :  { %v159_v26 = vmul.f32 %v636_v24, %v836_v23 }
 0x210   :  { %637 = vpow2.f32 %v157_v25  ;;  %v365_v25 = vld [vmem:[#allocation5 + $0x10] sm:$0xff] }
 0x211   :  { %v161_v27 = vsel %vm146_vm2, %v159_v26, 0.0  ;;  %390 = vmatpush.msrb.mxu1 %v365_v25 }
 0x212   :  { %162 = vadd.xlane.f32.xlu2 %v161_v27  ;;  %v363_v27 = vld [vmem:[#allocation5] sm:$0xff] }
 0x216   :  { %v638_v29 = vpop.eup %637 }
 0x217   :  { %v160_v30 = vmul.f32 %v638_v29, %v843_v28 }
 0x219   :  { %v164_v31 = vsel %vm146_vm2, %v160_v30, 0.0 }
 0x21a   :  { %165 = vadd.xlane.f32.xlu2 %v164_v31 }
 0x223   :  { %v182_v44 = vpop.permute.xlu1 %181 }
 0x232   :  { %183 = vrot.lane.b32.xlu2 %v106_v5, %s743_s0 }
 0x285   :  { %v163_v33 = vpop.xlane.xlu2 %162 }
 0x286   :  { %vm167_vm3 = vcmp.gt.f32.partialorder %v163_v33, 0.0 }
 0x287   :  { %v169_v34 = vsel %vm167_vm3, %v163_v33, 1.0 }
 0x288   :  { %639 = vrcp.f32 %v169_v34 }
 0x28d   :  { %v166_v35 = vpop.xlane.xlu2 %165 }
 0x28e   :  { %v640_v36 = vpop.eup %639  ;;  %vm168_vm4 = vcmp.gt.f32.partialorder %v166_v35, 0.0 }
 0x28f   :  { %v170_v37 = vsel %vm168_vm4, %v166_v35, 1.0  ;;  %v173_v38 = vmul.f32 %v640_v36, %v159_v26  ;;  %v364_v26 = vld [vmem:[#allocation5 + $0x8] sm:$0xff] }
 0x290   :  { %641 = vrcp.f32 %v170_v37  ;;  %391 = vmatpush.msrb.mxu1 %v364_v26  ;;  %v633_v37 = vld [vmem:[%s934_s8] ss:$0 sm:$0xff] }
 0x291   :  { %587 = vmatmul.msk.f32.vlgmr.msra.gmra.mxu2 %vm146_vm2, %v173_v38 }
 0x292   :  { %392 = vmatpush.msrb.mxu1 %v363_v27 }
 0x295   :  { %v184_v48 = vpop.permute.xlu2 %183 }
 0x296   :  { %v642_v39 = vpop.eup %641 }
 0x297   :  { %v174_v40 = vmul.f32 %v642_v39, %v160_v30 }
 0x299   :  { %588 = vmatmul.msk.f32.gmra.mxu2 %vm146_vm2, %v174_v40 }
 0x314   :  { %v210_v45 = vpop.f32.mrf.mxu2 }
 0x315   :  { %v211_v46 = vadd.f32 %v210_v45, %v182_v44 }
 0x317   :  { %v216_v47 = vmax.f32 %v211_v46, 0.0 }
 0x319   :  { %589 = vmatmul.msk.f32.vlgmr.msrb.gmra.mxu3 %vm114_vm1, %v216_v47 }
 0x31c   :  { %v213_v49 = vpop.f32.mrf.mxu2 }
 0x31d   :  { %v214_v50 = vadd.f32 %v213_v49, %v184_v48 }
 0x31f   :  { %v217_v51 = vmax.f32 %v214_v50, 0.0 }
 0x321   :  { %590 = vmatmul.msk.f32.gmra.mxu3 %vm114_vm1, %v217_v51 }
 0x39c   :  { %v249_v52 = vpop.f32.mrf.mxu3 }
 0x39d   :  { %v250_v56 = vadd.f32 %v632_v53, %v249_v52 }
 0x3a4   :  { %v252_v54 = vpop.f32.mrf.mxu3 }
 0x3a5   :  { %v253_v55 = vadd.f32 %v632_v53, %v252_v54 }
 0x3a7   :  { %259 = vrot.lane.b32.xlu0 %v253_v55, %s741_s16  ;;  %v621_v63 = vpack.i.bf16 %v250_v56, %v253_v55 }
 0x3af   :  { %257 = vrot.lane.b32.xlu0 %v250_v56, %s741_s16 }
 0x419   :  { %v260_v57 = vpop.permute.xlu0 %259 }
 0x41a   :  { %591 = vmatpush.xpose.msk.msrb.mxu0 %vm114_vm1, %v260_v57 }
 0x421   :  { %v258_v58 = vpop.permute.xlu0 %257 }
 0x422   :  { %592 = vmatpush.xpose.msk.msrb.mxu0 %vm114_vm1, %v258_v58 }
 0x425   :  { %593 = vmatmul.msk.f32.vlgmr.msrb.gmra.mxu0 %vm114_vm1, %v250_v56 }
 0x42d   :  { %594 = vmatmul.msk.f32.gmra.mxu0 %vm114_vm1, %v253_v55 }
 0x4a2   :  { %v286_v59 = vpop.f32.mrf.mxu0 }
 0x4a3   :  { %v292_v60 = vsel %vm146_vm2, %v286_v59, -inf }
 0x4a4   :  { %293 = vmax.xlane.f32.xlu0 %v292_v60 }
 0x4aa   :  { %v289_v61 = vpop.f32.mrf.mxu0 }
 0x4ab   :  { %v295_v62 = vsel %vm146_vm2, %v289_v61, -inf }
 0x4ac   :  { %296 = vmax.xlane.f32.xlu2 %v295_v62 }
 0x4b8   :  { %622 = vrot.lane.b32.xlu0 %v621_v63, %s742_s3 }
 0x517   :  { %v294_v0 = vpop.xlane.xlu0 %293 }
 0x518   :  { %v298_v1 = vsub.f32 %v286_v59, %v294_v0 }
 0x51a   :  { %v300_v2 = vmul.f32 1.442695, %v298_v1 }
 0x51c   :  { %643 = vpow2.f32 %v300_v2 }
 0x51f   :  { %v297_v3 = vpop.xlane.xlu2 %296 }
 0x520   :  { %v299_v4 = vsub.f32 %v289_v61, %v297_v3 }
 0x522   :  { %v644_v5 = vpop.eup %643  ;;  %v302_v6 = vmul.f32 1.442695, %v299_v4 }
 0x523   :  { %v304_v7 = vmul.f32 %v644_v5, %v836_v23 }
 0x524   :  { %645 = vpow2.f32 %v302_v6  ;;  %v533_v6 = vld [vmem:[%s935_s9 + $0x18] sm:$0xff] }
 0x525   :  { %v306_v8 = vsel %vm146_vm2, %v304_v7, 0.0  ;;  %553 = vmatpush.msra.mxu1 %v533_v6 }
 0x526   :  { %307 = vadd.xlane.f32.xlu1 %v306_v8  ;;  %v531_v8 = vld [vmem:[%s935_s9 + $0x8] sm:$0xff] }
 0x52a   :  { %v646_v9 = vpop.eup %645  ;;  %v623_v10 = vpop.permute.xlu0 %622 }
 0x52b   :  { %v624_v11 = vunpack.i.l.bf16 %v623_v10  ;;  %v305_v12 = vmul.f32 %v646_v9, %v843_v28  ;;  %v625_v14 = vunpack.i.h.bf16 %v623_v10  ;;  %v530_v9 = vld [vmem:[%s935_s9] sm:$0xff] }
 0x52d   :  { %352 = vmatpush.msrb.mxu2 %v624_v11  ;;  %v309_v13 = vsel %vm146_vm2, %v305_v12, 0.0 }
 0x52e   :  { %310 = vadd.xlane.f32.xlu2 %v309_v13 }
 0x52f   :  { %353 = vmatpush.msrb.mxu2 %v625_v14 }
 0x53f   :  { %326 = vrot.lane.b32.xlu1 %v250_v56, %s743_s0 }
 0x546   :  { %328 = vrot.lane.b32.xlu2 %v253_v55, %s743_s0 }
 0x599   :  { %v308_v16 = vpop.xlane.xlu1 %307 }
 0x59a   :  { %vm312_vm5 = vcmp.gt.f32.partialorder %v308_v16, 0.0 }
 0x59b   :  { %v314_v17 = vsel %vm312_vm5, %v308_v16, 1.0  ;;  %v506_v16 = vld [vmem:[#allocation2] sm:$0x3] }
 0x59c   :  { %647 = vrcp.f32 %v314_v17 }
 0x5a1   :  { %v311_v18 = vpop.xlane.xlu2 %310 }
 0x5a2   :  { %v648_v19 = vpop.eup %647  ;;  %vm313_vm6 = vcmp.gt.f32.partialorder %v311_v18, 0.0 }
 0x5a3   :  { %v315_v20 = vsel %vm313_vm6, %v311_v18, 1.0  ;;  %v318_v21 = vmul.f32 %v648_v19, %v304_v7  ;;  %v532_v7 = vld [vmem:[%s935_s9 + $0x10] sm:$0xff]  ;;  %v634_v18 = vld [vmem:[%s936_s10] ss:$0 sm:$0xff]  ;;  %s744_s9 = smov [#allocation7]  }
 0x5a4   :  { %649 = vrcp.f32 %v315_v20  ;;  %554 = vmatpush.msra.mxu1 %v532_v7 }
 0x5a5   :  { %595 = vmatmul.msk.f32.vlgmr.msrb.gmra.mxu2 %vm146_vm2, %v318_v21 }
 0x5a6   :  { %555 = vmatpush.msra.mxu1 %v531_v8 }
 0x5a8   :  { %556 = vmatpush.msra.mxu1 %v530_v9 }
 0x5a9   :  { %v329_v33 = vpop.permute.xlu2 %328 }
 0x5aa   :  { %v650_v22 = vpop.eup %649 }
 0x5ab   :  { %v319_v24 = vmul.f32 %v650_v22, %v305_v12 }
 0x5ad   :  { %596 = vmatmul.msk.f32.gmra.mxu2 %vm146_vm2, %v319_v24 }
 0x5b1   :  { %v327_v29 = vpop.permute.xlu1 %326 }
 0x628   :  { %v355_v30 = vpop.f32.mrf.mxu2 }
 0x629   :  { %v356_v31 = vadd.f32 %v355_v30, %v327_v29 }
 0x62b   :  { %v361_v32 = vmax.f32 %v356_v31, 0.0 }
 0x62d   :  { %597 = vmatmul.msk.f32.vlgmr.msrb.gmra.mxu1 %vm114_vm1, %v361_v32 }
 0x630   :  { %v358_v34 = vpop.f32.mrf.mxu2 }
 0x631   :  { %v359_v35 = vadd.f32 %v358_v34, %v329_v33 }
 0x633   :  { %v362_v36 = vmax.f32 %v359_v35, 0.0 }
 0x635   :  { %598 = vmatmul.msk.f32.gmra.mxu1 %vm114_vm1, %v362_v36 }
 0x6aa   :  { %v394_v38 = vpop.f32.mrf.mxu1 }
 0x6ab   :  { %v395_v39 = vadd.f32 %v633_v37, %v394_v38 }
 0x6ad   :  { %402 = vrot.lane.b32.xlu1 %v395_v39, %s741_s16 }
 0x6b2   :  { %v397_v40 = vpop.f32.mrf.mxu1 }
 0x6b3   :  { %v398_v41 = vadd.f32 %v633_v37, %v397_v40 }
 0x6b5   :  { %404 = vrot.lane.b32.xlu0 %v398_v41, %s741_s16  ;;  %v626_v48 = vpack.i.bf16 %v395_v39, %v398_v41 }
 0x71f   :  { %v403_v43 = vpop.permute.xlu1 %402 }
 0x727   :  { %v405_v42 = vpop.permute.xlu0 %404 }
 0x728   :  { %599 = vmatpush.xpose.msk.msra.mxu3 %vm114_vm1, %v405_v42 }
 0x72c   :  { %600 = vmatpush.xpose.msk.msra.mxu3 %vm114_vm1, %v403_v43 }
 0x72f   :  { %601 = vmatmul.msk.f32.vlgmr.msra.gmra.mxu3 %vm114_vm1, %v395_v39 }
 0x737   :  { %602 = vmatmul.msk.f32.gmra.mxu3 %vm114_vm1, %v398_v41 }
 0x7b2   :  { %v431_v44 = vpop.f32.mrf.mxu3 }
 0x7b3   :  { %v437_v45 = vsel %vm146_vm2, %v431_v44, -inf }
 0x7b4   :  { %438 = vmax.xlane.f32.xlu0 %v437_v45 }
 0x7ba   :  { %v434_v46 = vpop.f32.mrf.mxu3 }
 0x7bb   :  { %v440_v47 = vsel %vm146_vm2, %v434_v46, -inf }
 0x7bc   :  { %441 = vmax.xlane.f32.xlu2 %v440_v47 }
 0x7d4   :  { %627 = vrot.lane.b32.xlu2 %v626_v48, %s742_s3  ;;  %s568_s3 = sshll.u32 %s744_s9, 4  ;;  %s569_s3 = int_to_ptr.vmem [resolvable:$true] %s568_s3 }
 0x827   :  { %v439_v49 = vpop.xlane.xlu0 %438 }
 0x828   :  { %v443_v50 = vsub.f32 %v431_v44, %v439_v49 }
 0x82a   :  { %v445_v51 = vmul.f32 1.442695, %v443_v50 }
 0x82c   :  { %651 = vpow2.f32 %v445_v51 }
 0x82f   :  { %v442_v52 = vpop.xlane.xlu2 %441 }
 0x830   :  { %v444_v53 = vsub.f32 %v434_v46, %v442_v52 }
 0x832   :  { %v652_v54 = vpop.eup %651  ;;  %v447_v55 = vmul.f32 1.442695, %v444_v53 }
 0x833   :  { %v449_v56 = vmul.f32 %v652_v54, %v836_v23 }
 0x834   :  { %653 = vpow2.f32 %v447_v55 }
 0x835   :  { %v451_v57 = vsel %vm146_vm2, %v449_v56, 0.0 }
 0x836   :  { %452 = vadd.xlane.f32.xlu1 %v451_v57 }
 0x837   :  { %v628_v58 = vpop.permute.xlu2 %627 }
 0x838   :  { %v629_v59 = vunpack.i.l.bf16 %v628_v58  ;;  %v630_v61 = vunpack.i.h.bf16 %v628_v58 }
 0x83a   :  { %v654_v60 = vpop.eup %653  ;;  %497 = vmatpush.msra.mxu0 %v629_v59 }
 0x83b   :  { %v450_v62 = vmul.f32 %v654_v60, %v843_v28 }
 0x83c   :  { %498 = vmatpush.msra.mxu0 %v630_v61 }
 0x83d   :  { %v454_v63 = vsel %vm146_vm2, %v450_v62, 0.0 }
 0x83e   :  { %455 = vadd.xlane.f32.xlu0 %v454_v63 }
 0x84f   :  { %473 = vrot.lane.b32.xlu1 %v398_v41, %s743_s0 }
 0x852   :  { %471 = vrot.lane.b32.xlu0 %v395_v39, %s743_s0 }
 0x8a9   :  { %v453_v23 = vpop.xlane.xlu1 %452 }
 0x8aa   :  { %vm457_vm7 = vcmp.gt.f32.partialorder %v453_v23, 0.0 }
 0x8ab   :  { %v459_v0 = vsel %vm457_vm7, %v453_v23, 1.0 }
 0x8ac   :  { %655 = vrcp.f32 %v459_v0 }
 0x8b1   :  { %v456_v1 = vpop.xlane.xlu0 %455 }
 0x8b2   :  { %v656_v2 = vpop.eup %655  ;;  %vm458_vm8 = vcmp.gt.f32.partialorder %v456_v1, 0.0 }
 0x8b3   :  { %v463_v3 = vmul.f32 %v656_v2, %v449_v56  ;;  %v460_v4 = vsel %vm458_vm8, %v456_v1, 1.0 }
 0x8b4   :  { %657 = vrcp.f32 %v460_v4 }
 0x8b5   :  { %603 = vmatmul.msk.f32.vlgmr.msra.gmra.mxu0 %vm146_vm2, %v463_v3 }
 0x8ba   :  { %v658_v28 = vpop.eup %657 }
 0x8bb   :  { %v464_v5 = vmul.f32 %v658_v28, %v450_v62 }
 0x8bd   :  { %604 = vmatmul.msk.f32.gmra.mxu0 %vm146_vm2, %v464_v5 }
 0x8c1   :  { %v474_v11 = vpop.permute.xlu1 %473 }
 0x8c4   :  { %v472_v14 = vpop.permute.xlu0 %471 }
 0x932   :  { %v500_v10 = vpop.f32.mrf.mxu0 }
 0x933   :  { %v501_v15 = vadd.f32 %v500_v10, %v472_v14 }
 0x93a   :  { %v503_v12 = vpop.f32.mrf.mxu0 }
 0x93b   :  { %v504_v13 = vadd.f32 %v503_v12, %v474_v11 }
 0x93d   :  { %524 = vmatpush.msra.mxu2 %v504_v13 }
 0x93f   :  { %525 = vmatpush.msra.mxu2 %v501_v15 }
 0x940   :  { %605 = vmatmul.msk.f32.vlgmr.msra.gmra.mxu2 %vm146_vm2, %v506_v16 }
 0x9c3   :  { %v527_v17 = vpop.f32.mrf.mxu2 }
 0x9c4   :  { %606 = vmatmul.msk.f32.vlgmr.msra.gmra.mxu1 %vm114_vm1, %v527_v17 }
 0xa41   :  { %v558_v19 = vpop.f32.mrf.mxu1 }
 0xa42   :  { %v559_v20 = vadd.f32 %v634_v18, %v558_v19 }
 0xa44   :  { %562 = vst.msk [vmem:[#allocation7] sm:$0x3] %vm561_vm9, %v559_v20 }
 0xa45   :  { %573 = dma.vmem_to_hbm [thread:$0]  %s569_s3, 32, %s571_s17, [#allocation4]  }
 0xa46   :  { %735 = dma.done.wait [#allocation4], 32  }
 0xa47   :  { %736 = vsyncadd [#allocation4], 4294967264 }
 0xa48   :  { %578 = vsyncpa [#allocation3], 1 }
 0xa49   :  { %579 = vsyncpa [#allocation6], 1 }
 0xa4a   :  { %580 = vsyncpa [#allocation4], 1 }

</bundles_post_ra>
